<compile_context>
chip_gen: v6e
topology: v6e:2x2x1
jax: 0.10.0
libtpu: 0.0.40
codegen_flags: <defaults>
</compile_context>

<pallas_src>
import functools

import jax
import jax.numpy as jnp
from jax import lax
from jax.experimental import pallas as pl
from jax.experimental.pallas import tpu as pltpu

K = 7  # kernel size (7, 7), as in nn.Conv2d(1, 1, kernel_size=(7, 7))

# Per-block working-set budget (double-buffered input+output plus in-kernel
# temporaries).  Conservative so it is safe on v7x (64 MiB VMEM per TC);
# v5e/v6e (128 MiB physical) could go ~2x higher.
_VMEM_BLOCK_BUDGET = 16 * 1024 * 1024
_VMEM_LIMIT_BYTES = 48 * 1024 * 1024

# Small-image cutoff for the fully flattened single-matmul path.
_FLAT_MAX_PIXELS = 2048
_FLAT_MAX_T_BYTES = 8 * 1024 * 1024


def _round_up(x, m):
    return (x + m - 1) // m * m


# ----------------------------------------------------------------------------
# Kernels
# ----------------------------------------------------------------------------
def _conv7x7_flat_kernel(b_ref, x_ref, t_ref, o_ref, *, mm_precision):
    """Small-image path: one matmul does the whole 7x7 VALID conv.

    b_ref: (1,)          f32 SMEM  bias
    x_ref: (nb, H*W)     VMEM      flattened images
    t_ref: (H*W, No_pad) VMEM      full Toeplitz (weights baked in), resident
    o_ref: (nb, No_pad)  VMEM      flattened outputs, lane-dense (No_pad % 128 == 0)
    """
    y = jnp.dot(x_ref[...], t_ref[...],
                preferred_element_type=jnp.float32, precision=mm_precision)
    o_ref[...] = (y + b_ref[0]).astype(o_ref.dtype)


def _conv7x7_rows_kernel(b_ref, x_ref, t_ref, o_ref, *, mm_precision):
    """General path: one concatenated-Toeplitz matmul + in-place 7-tap reduce.

    b_ref: (1,)                 f32 SMEM  bias
    x_ref: (nb, Hp, W)          VMEM      images, Hp % 8 == 0 (zero-padded rows)
    t_ref: (W, K*Wo_pad)        VMEM      per-row Toeplitz blocks, lane-concatenated
    o_ref: (nb, Ho_pad, Wo_pad) VMEM      output, Wo_pad % 128 == 0 (lane-dense)
    """
    nb, hp, wdim = x_ref.shape
    _, ho_pad, wo_pad = o_ref.shape

    # Hp % 8 == 0 -> merging the leading dims into the sublane dim is layout-free.
    x2 = x_ref[...].reshape(nb * hp, wdim)
    # Single fused MXU call: p[., ki*Wo_pad + c] = sum_kj x[., c + kj] * w[ki, kj].
    p = jnp.dot(x2, t_ref[...],
                preferred_element_type=jnp.float32, precision=mm_precision)
    p = p.reshape(nb, hp, K * wo_pad)

    # ki (sublane-direction) reduction, accumulated in place; the lane slices
    # are 128-aligned because Wo_pad % 128 == 0.
    # TODO(synk): switch the ki>0 sublane slices to pltpu.roll (idle XLU slot)
    #             if the Mosaic dump shows relayout copies here.
    acc = p[:, 0:ho_pad, 0:wo_pad]
    for ki in range(1, K):
        acc = acc + p[:, ki:ki + ho_pad, ki * wo_pad:(ki + 1) * wo_pad]

    o_ref[...] = (acc + b_ref[0]).astype(o_ref.dtype)


# ----------------------------------------------------------------------------
# Toeplitz construction (weights baked in; built once in the wrapper)
# ----------------------------------------------------------------------------
def _toeplitz_full(w, H, W, Ho, Wo, no_pad, dtype):
    """T[h*W + x, oh*Wo + ow] = w[h - oh, x - ow] inside the 7x7 window, else 0."""
    hw = jnp.arange(H * W)
    h, xw = hw // W, hw % W
    o = jnp.arange(no_pad)
    oh, ow = o // Wo, o % Wo
    dh = h[:, None] - oh[None, :]
    dw = xw[:, None] - ow[None, :]
    valid = (dh >= 0) & (dh < K) & (dw >= 0) & (dw < K) & (o[None, :] < Ho * Wo)
    t = jnp.where(valid, w[jnp.clip(dh, 0, K - 1), jnp.clip(dw, 0, K - 1)], 0.0)
    return t.astype(dtype)


def _toeplitz_rows(w, W, Wo, wo_pad, dtype):
    """Lane-concatenated per-row Toeplitz: T[r, ki*wo_pad + c] = w[ki, r - c]."""
    r = jnp.arange(W)[:, None]
    c = jnp.arange(wo_pad)[None, :]
    d = r - c
    valid = (d >= 0) & (d < K) & (c < Wo)
    t = jnp.where(valid[None, :, :], w[:, jnp.clip(d, 0, K - 1)], 0.0)  # (K, W, wo_pad)
    return jnp.transpose(t, (1, 0, 2)).reshape(W, K * wo_pad).astype(dtype)


# ----------------------------------------------------------------------------
# Padding-aware block-batch sizing
# ----------------------------------------------------------------------------
def _pick_block_batch(n, bytes_per_image, budget_bytes, sublane_step=1):
    """Largest batch block whose padding-aware footprint fits `budget_bytes`.

    `sublane_step=8` is used when the batch dim is the second-to-last block dim
    (flattened path): blocks must then be a multiple of 8 or the full batch.
    """
    cap = int(budget_bytes // max(int(bytes_per_image), 1))
    if cap >= n or n <= sublane_step:
        return n
    nb = min(n, max(sublane_step, (cap // sublane_step) * sublane_step))
    while nb > sublane_step and n % nb:       # avoid ragged trailing blocks
        nb -= sublane_step
    return nb if n % nb == 0 else n           # no clean split: take the whole batch


# ----------------------------------------------------------------------------
# Wrapper
# ----------------------------------------------------------------------------
def conv7x7(x, w, b, *, mm_precision=lax.Precision.HIGHEST):
    """x: (N, 1, H, W), w: (7, 7), b: (1,) -> (N, 1, H-6, W-6)  (VALID 7x7 conv)."""
    N, C, H, W = x.shape
    assert C == 1, "Model3x3 uses in_channels = out_channels = 1"
    assert H >= K and W >= K, "input must be at least 7x7 for a VALID 7x7 conv"
    Ho, Wo = H - K + 1, W - K + 1

    if x.dtype not in (jnp.dtype(jnp.float32), jnp.dtype(jnp.bfloat16)):
        x = x.astype(jnp.float32)
    cdt = x.dtype                       # MXU operand / output dtype
    itemsize = jnp.dtype(cdt).itemsize
    wc = w.astype(jnp.float32)
    bias = b.astype(jnp.float32).reshape(1)

    no_pad = _round_up(Ho * Wo, 128)
    use_flat = (H * W <= _FLAT_MAX_PIXELS
                and H * W * no_pad * itemsize <= _FLAT_MAX_T_BYTES)

    params = pltpu.CompilerParams(
        dimension_semantics=("parallel",),
        vmem_limit_bytes=_VMEM_LIMIT_BYTES,
    )

    if use_flat:
        # ---- small-image path: a single matmul, lane-dense output ----
        x2 = x.reshape(N, H * W)
        t = _toeplitz_full(wc, H, W, Ho, Wo, no_pad, cdt)          # (H*W, no_pad)

        t_bytes = 2 * _round_up(H * W, 8) * no_pad * itemsize      # double-buffered
        per_img = (2 * (_round_up(H * W, 128) + no_pad) * itemsize  # in/out, 2 bufs
                   + no_pad * 4)                                   # f32 matmul temp
        nb = _pick_block_batch(N, per_img,
                               max(1 << 20, _VMEM_BLOCK_BUDGET - t_bytes),
                               sublane_step=8)
        grid = (pl.cdiv(N, nb),)

        kernel = functools.partial(_conv7x7_flat_kernel, mm_precision=mm_precision)
        out2 = pl.pallas_call(
            kernel,
            out_shape=jax.ShapeDtypeStruct((N, no_pad), cdt),
            grid_spec=pltpu.PrefetchScalarGridSpec(
                num_scalar_prefetch=0,
                grid=grid,
                in_specs=[
                    pl.BlockSpec(memory_space=pltpu.SMEM),             # bias (1,)
                    pl.BlockSpec((nb, H * W), lambda n: (n, 0)),       # images
                    pl.BlockSpec((H * W, no_pad), lambda n: (0, 0)),   # Toeplitz, resident
                ],
                out_specs=pl.BlockSpec((nb, no_pad), lambda n: (n, 0)),
            ),
            compiler_params=params,
        )(bias, x2, t)
        return out2[:, :Ho * Wo].reshape(N, 1, Ho, Wo)

    # ---- general path: concatenated-Toeplitz matmul + 7-tap reduction ----
    wo_pad = _round_up(Wo, 128)
    ho_pad = _round_up(Ho, 8)
    hp = _round_up(ho_pad + K - 1, 8)           # rows needed by the ki taps
    x3 = jnp.pad(x.reshape(N, H, W), ((0, 0), (0, hp - H), (0, 0)))
    t = _toeplitz_rows(wc, W, Wo, wo_pad, cdt)                      # (W, K*wo_pad)

    t_bytes = 2 * _round_up(W, 8) * K * wo_pad * itemsize
    per_img = (2 * (hp * _round_up(W, 128) + ho_pad * wo_pad) * itemsize
               + hp * K * wo_pad * 4)                               # f32 matmul temp
    nb = _pick_block_batch(N, per_img,
                           max(1 << 20, _VMEM_BLOCK_BUDGET - t_bytes),
                           sublane_step=1)
    grid = (pl.cdiv(N, nb),)

    # TODO(synk): if the grid gets long with tiny per-step work, bump the image
    #             spec to pipeline_mode=pl.Buffered(3) and keep the winner.
    kernel = functools.partial(_conv7x7_rows_kernel, mm_precision=mm_precision)
    out3 = pl.pallas_call(
        kernel,
        out_shape=jax.ShapeDtypeStruct((N, ho_pad, wo_pad), cdt),
        grid_spec=pltpu.PrefetchScalarGridSpec(
            num_scalar_prefetch=0,
            grid=grid,
            in_specs=[
                pl.BlockSpec(memory_space=pltpu.SMEM),                 # bias (1,)
                pl.BlockSpec((nb, hp, W), lambda n: (n, 0, 0)),        # images (+pad rows)
                pl.BlockSpec((W, K * wo_pad), lambda n: (0, 0)),       # Toeplitz, resident
            ],
            out_specs=pl.BlockSpec((nb, ho_pad, wo_pad), lambda n: (n, 0, 0)),
        ),
        compiler_params=params,
    )(bias, x3, t)
    return out3[:, :Ho, :Wo].reshape(N, 1, Ho, Wo)


def conv7x7_ref(x, w, b):
    """Pure-JAX reference (NCHW, OIHW) for the correctness check."""
    y = lax.conv_general_dilated(
        x.astype(jnp.float32), w.reshape(1, 1, K, K).astype(jnp.float32),
        window_strides=(1, 1), padding="VALID",
        dimension_numbers=("NCHW", "OIHW", "NCHW"),
        precision=lax.Precision.HIGHEST,
    )
    return y + b.reshape(1, 1, 1, 1)


if __name__ == "__main__":
    key = jax.random.PRNGKey(0)
    kx, kw, kb = jax.random.split(key, 3)

    # Small shapes consistent with Conv2d(1, 1, kernel_size=(7, 7)).
    N, C, H, W = 2, 1, 16, 16
    x = jax.random.normal(kx, (N, C, H, W), dtype=jnp.float32)

    # Param init mimicking PyTorch's uniform(-1/sqrt(fan_in), ...), fan_in = 49.
    bound = 1.0 / jnp.sqrt(jnp.float32(K * K))
    w = jax.random.uniform(kw, (K, K), jnp.float32, -bound, bound)
    b = jax.random.uniform(kb, (1,), jnp.float32, -bound, bound)

    try:
        out = jax.block_until_ready(conv7x7(x, w, b))
    except Exception:
        # Fallback for Mosaic lowerings that only accept DEFAULT matmul precision.
        out = jax.block_until_ready(conv7x7(x, w, b, mm_precision=None))

    ref = conv7x7_ref(x, w, b)
    assert out.shape == (N, 1, H - K + 1, W - K + 1)
    err = float(jnp.max(jnp.abs(out - ref)))
    # 1e-2 accommodates a possible reduced-precision (bf16-pass) matmul fallback.
    assert jnp.allclose(out, ref, atol=1e-2, rtol=1e-2), err
    print("KERNEL_OK")
</pallas_src>

<mosaic_0001>
module attributes {stable_mosaic.version = 11 : i64} {
  func.func @_conv7x7_flat_kernel(%arg0: i32, %arg1: memref<1xf32, #tpu.memory_space<smem>>, %arg2: memref<2x256xf32, #tpu.memory_space<vmem>>, %arg3: memref<256x128xf32, #tpu.memory_space<vmem>>, %arg4: memref<2x128xf32, #tpu.memory_space<vmem>>) attributes {dimension_semantics = [#tpu.dimension_semantics<parallel>], iteration_bounds = array<i64: 1>, scalar_prefetch = 0 : i64, scratch_operands = 0 : i64, tpu.core_type = #tpu.core_type<tc>, window_params = [{transform_indices = @transform_0, window_bounds = array<i64: 1>}, {transform_indices = @transform_1, window_bounds = array<i64: 2, 256>}, {pipeline_mode = #tpu.pipeline_mode<synchronous>, transform_indices = @transform_2, window_bounds = array<i64: 256, 128>}, {transform_indices = @transform_3, window_bounds = array<i64: 2, 128>}]} {
    %c0 = arith.constant 0 : index
    %c0_0 = arith.constant 0 : index
    %0 = vector.load %arg2[%c0, %c0_0] : memref<2x256xf32, #tpu.memory_space<vmem>>, vector<2x256xf32>
    %c0_1 = arith.constant 0 : index
    %c0_2 = arith.constant 0 : index
    %1 = vector.load %arg3[%c0_1, %c0_2] : memref<256x128xf32, #tpu.memory_space<vmem>>, vector<256x128xf32>
    %cst = arith.constant dense<0.000000e+00> : vector<2x128xf32>
    %2 = tpu.matmul %0, %1, %cst {dimension_numbers = #tpu.dot_dimension_numbers<[1], [0], [0], [1], [0, 0, 1, 1], [], []>, precision = #tpu.contract_precision<fp32>} : vector<2x256xf32>, vector<256x128xf32>, vector<2x128xf32> -> vector<2x128xf32>
    %c0_3 = arith.constant 0 : index
    %3 = memref.load %arg1[%c0_3] : memref<1xf32, #tpu.memory_space<smem>>
    %4 = vector.broadcast %3 : f32 to vector<2x128xf32>
    %5 = arith.addf %2, %4 : vector<2x128xf32>
    %c0_4 = arith.constant 0 : index
    %c0_5 = arith.constant 0 : index
    %6 = vector.load %arg4[%c0_4, %c0_5] : memref<2x128xf32, #tpu.memory_space<vmem>>, vector<2x128xf32>
    tpu.vector_store %arg4[%c0_4, %c0_5], %5 {strides = array<i32>} : memref<2x128xf32, #tpu.memory_space<vmem>>, vector<2x128xf32>,
    return
  }
  func.func @transform_0(%arg0: i32) -> i32 {
    %c0_i32 = arith.constant 0 : i32
    %c0_i32_0 = arith.constant 0 : i32
    return %c0_i32 : i32
  }
  func.func @transform_1(%arg0: i32) -> (i32, i32) {
    %c0_i32 = arith.constant 0 : i32
    %c0_i32_0 = arith.constant 0 : i32
    return %arg0, %c0_i32 : i32, i32
  }
  func.func @transform_2(%arg0: i32) -> (i32, i32) {
    %c0_i32 = arith.constant 0 : i32
    %c0_i32_0 = arith.constant 0 : i32
    %c0_i32_1 = arith.constant 0 : i32
    return %c0_i32, %c0_i32_0 : i32, i32
  }
  func.func @transform_3(%arg0: i32) -> (i32, i32) {
    %c0_i32 = arith.constant 0 : i32
    %c0_i32_0 = arith.constant 0 : i32
    return %arg0, %c0_i32 : i32, i32
  }
}

module attributes {stable_mosaic.version = 11 : i64} {
  func.func @_conv7x7_flat_kernel(%arg0: i32, %arg1: memref<1xf32, #tpu.memory_space<smem>>, %arg2: memref<2x256xf32, #tpu.memory_space<vmem>>, %arg3: memref<256x128xf32, #tpu.memory_space<vmem>>, %arg4: memref<2x128xf32, #tpu.memory_space<vmem>>) attributes {dimension_semantics = [#tpu.dimension_semantics<parallel>], iteration_bounds = array<i64: 1>, scalar_prefetch = 0 : i64, scratch_operands = 0 : i64, tpu.core_type = #tpu.core_type<tc>, window_params = [{transform_indices = @transform_0, window_bounds = array<i64: 1>}, {transform_indices = @transform_1, window_bounds = array<i64: 2, 256>}, {pipeline_mode = #tpu.pipeline_mode<synchronous>, transform_indices = @transform_2, window_bounds = array<i64: 256, 128>}, {transform_indices = @transform_3, window_bounds = array<i64: 2, 128>}]} {
    %c0 = arith.constant 0 : index
    %c0_0 = arith.constant 0 : index
    %0 = vector.load %arg2[%c0, %c0_0] : memref<2x256xf32, #tpu.memory_space<vmem>>, vector<2x256xf32>
    %c0_1 = arith.constant 0 : index
    %c0_2 = arith.constant 0 : index
    %1 = vector.load %arg3[%c0_1, %c0_2] : memref<256x128xf32, #tpu.memory_space<vmem>>, vector<256x128xf32>
    %cst = arith.constant dense<0.000000e+00> : vector<2x128xf32>
    %2 = tpu.matmul %0, %1, %cst {dimension_numbers = #tpu.dot_dimension_numbers<[1], [0], [0], [1], [0, 0, 1, 1], [], []>} : vector<2x256xf32>, vector<256x128xf32>, vector<2x128xf32> -> vector<2x128xf32>
    %c0_3 = arith.constant 0 : index
    %3 = memref.load %arg1[%c0_3] : memref<1xf32, #tpu.memory_space<smem>>
    %4 = vector.broadcast %3 : f32 to vector<2x128xf32>
    %5 = arith.addf %2, %4 : vector<2x128xf32>
    %c0_4 = arith.constant 0 : index
    %c0_5 = arith.constant 0 : index
    %6 = vector.load %arg4[%c0_4, %c0_5] : memref<2x128xf32, #tpu.memory_space<vmem>>, vector<2x128xf32>
    tpu.vector_store %arg4[%c0_4, %c0_5], %5 {strides = array<i32>} : memref<2x128xf32, #tpu.memory_space<vmem>>, vector<2x128xf32>,
    return
  }
  func.func @transform_0(%arg0: i32) -> i32 {
    %c0_i32 = arith.constant 0 : i32
    %c0_i32_0 = arith.constant 0 : i32
    return %c0_i32 : i32
  }
  func.func @transform_1(%arg0: i32) -> (i32, i32) {
    %c0_i32 = arith.constant 0 : i32
    %c0_i32_0 = arith.constant 0 : i32
    return %arg0, %c0_i32 : i32, i32
  }
  func.func @transform_2(%arg0: i32) -> (i32, i32) {
    %c0_i32 = arith.constant 0 : i32
    %c0_i32_0 = arith.constant 0 : i32
    %c0_i32_1 = arith.constant 0 : i32
    return %c0_i32, %c0_i32_0 : i32, i32
  }
  func.func @transform_3(%arg0: i32) -> (i32, i32) {
    %c0_i32 = arith.constant 0 : i32
    %c0_i32_0 = arith.constant 0 : i32
    return %arg0, %c0_i32 : i32, i32
  }
}

</mosaic_0001>

<bundles_post_ra>
// kernel: tpu_custom_call.1
= control target key start
LH: loop header
LB: loop body
LE: loop exit
PB: predicated region body
PF: predicated region fallthrough
CT: control target
= control target key end

     0   :  { %9 = vsyncpa [#allocation4], 0  ;;  %s1888_s0 = inlined_call_operand.<no memory space> [shape: f32[1], index: 0, kind: input, shape index: {}]   ;;  %s1889_s1 = inlined_call_operand.hbm [shape: f32[2,256], index: 1, kind: input, shape index: {}]   ;;  %s1890_s2 = inlined_call_operand.hbm [shape: f32[256,128], index: 2, kind: input, shape index: {}]   ;;  %s1891_s3 = inlined_call_operand.hbm [shape: f32[2,128], index: 3, kind: output, shape index: {}]  }
   0x1   :  { %10 = vsyncpa [#allocation7], 0 }
   0x2   :  { %11 = vsyncpa [#allocation5], 0  ;;  %s1249_s12 = smov [#allocation3]   ;;  %s1250_s14 = smov [#allocation6]  }
   0x3   :  { %s20_s13 = sshll.u32 %s1249_s12, 4  ;;  %s29_s15 = sshll.u32 %s1250_s14, 4  ;;  %s21_s13 = int_to_ptr.vmem [resolvable:$true] %s20_s13  ;;  %s30_s15 = int_to_ptr.vmem [resolvable:$true] %s29_s15 }
   0x4   :  { %s1191_s16 = scalar_lea.vmem %s21_s13, 64  ;;  %p1196_p1 = scmp.lt.s32.totalorder %s21_s13, %s21_s13 }
   0x5   :  { %p1192_p0 = scmp.ne.s32.totalorder %s21_s13, %s1191_s16  ;;  %p1197_p2 = scmp.lt.s32.totalorder %s1191_s16, %s1191_s16 }
   0x7   :  { %p1198_p3 = por %p1197_p2, %p1196_p1 }
   0x9   :  { %p1199_p4 = pnand %p1198_p3, %p1192_p0 }
   0xb   :  { %1202 = shalt.err (!%p1199_p4)
}
   0xc   :  { %23 = dma.hbm_to_vmem [thread:$0]  %s1889_s1, 64, %s21_s13, [#allocation4]  }
   0xd   :  { %s1211_s19 = scalar_lea.vmem %s30_s15, 4096  ;;  %p1216_p6 = scmp.lt.s32.totalorder %s30_s15, %s30_s15 }
   0xe   :  { %p1212_p5 = scmp.ne.s32.totalorder %s30_s15, %s1211_s19  ;;  %p1217_p7 = scmp.lt.s32.totalorder %s1211_s19, %s1211_s19 }
  0x10   :  { %p1218_p8 = por %p1217_p7, %p1216_p6 }
  0x12   :  { %p1219_p9 = pnand %p1218_p8, %p1212_p5 }
  0x14   :  { %1222 = shalt.err (!%p1219_p9)
}
  0x15   :  { %s1251_s20 = smov 128   ;;  %s1252_s21 = smov 8  }
  0x16   :  { %35 = dma.hbm_to_vmem [thread:$0]  %s1890_s2, 4096, %s30_s15, [#allocation7], %s1251_s20, %s1251_s20, %s1252_s21  }
  0x17   :  { %1243 = dma.done.wait [#allocation4], 64  }
  0x18   :  { %1244 = vsyncadd [#allocation4], 4294967232 }
  0x19   :  { %1245 = dma.done.wait [#allocation7], 4096  }
  0x1a   :  { %1246 = vsyncadd [#allocation7], 4294963200  ;;  %v74_v0 = vld [vmem:[#allocation6 + $0xf8] sm:$0xff]  ;;  %v73_v2 = vld [vmem:[#allocation6 + $0xf0] sm:$0xff]  ;;  %s1253_s24 = smov [#allocation8]  }
  0x1b   :  { %v58_v1 = vld [vmem:[#allocation6 + $0x78] sm:$0xff]  ;;  %v1280_v3 = vand.u32 4294901760, %v74_v0  ;;  %v1284_v5 = vand.u32 4294901760, %v73_v2  ;;  %v57_v6 = vld [vmem:[#allocation6 + $0x70] sm:$0xff]  ;;  %v72_v7 = vld [vmem:[#allocation6 + $0xe8] sm:$0xff]  ;;  %s957_s25 = sshll.u32 %s1253_s24, 4  ;;  %s958_s25 = int_to_ptr.vmem [resolvable:$true] %s957_s25 }
  0x1c   :  { %v1282_v4 = vand.u32 4294901760, %v58_v1  ;;  %v56_v8 = vld [vmem:[#allocation6 + $0x68] sm:$0xff]  ;;  %v1286_v9 = vand.u32 4294901760, %v57_v6  ;;  %v1288_v10 = vand.u32 4294901760, %v72_v7  ;;  %v71_v12 = vld [vmem:[#allocation6 + $0xe0] sm:$0xff]  ;;  %v70_v14 = vld [vmem:[#allocation6 + $0xd8] sm:$0xff]  ;;  %p1228_p11 = scmp.lt.s32.totalorder %s958_s25, %s958_s25 }
  0x1d   :  { %v1290_v11 = vand.u32 4294901760, %v56_v8  ;;  %v55_v13 = vld [vmem:[#allocation6 + $0x60] sm:$0xff]  ;;  %968 = vmatprep.subr.mxu0 %v1280_v3  ;;  %v1293_v15 = vand.u32 4294901760, %v71_v12  ;;  %v1297_v17 = vand.u32 4294901760, %v70_v14  ;;  %v1300_v18 = vsub.f32 %v74_v0, %v1280_v3  ;;  %v1302_v19 = vld [vmem:[#allocation6 + $0x58] sm:$0xff]  ;;  %v1304_v20 = vld [vmem:[#allocation6 + $0xd0] sm:$0xff] }
  0x1e   :  { %v1295_v16 = vand.u32 4294901760, %v55_v13  ;;  %v1306_v21 = vld [vmem:[#allocation6 + $0x50] sm:$0xff]  ;;  %969 = vmatpush3.msra.mxu0 %v1282_v4  ;;  %v1310_v22 = vand.u32 4294901760, %v1302_v19  ;;  %v1313_v23 = vsub.f32 %v58_v1, %v1282_v4  ;;  %v1316_v24 = vand.u32 4294901760, %v1304_v20  ;;  %v1321_v26 = vld [vmem:[#allocation6 + $0xc8] sm:$0xff]  ;;  %v1325_v28 = vld [vmem:[#allocation6 + $0xc0] sm:$0xff] }
  0x1f   :  { %v1319_v25 = vsub.f32 %v73_v2, %v1284_v5  ;;  %v1323_v27 = vld [vmem:[#allocation6 + $0x48] sm:$0xff]  ;;  %970 = vmatprep.subr.mxu0 %v1284_v5  ;;  %v1905_v29 = vand.u32 4294901760, %v1300_v18  ;;  %v1330_v30 = vand.u32 4294901760, %v1306_v21  ;;  %v1333_v31 = vsub.f32 %v57_v6, %v1286_v9  ;;  %v1347_v37 = vld [vmem:[#allocation6 + $0x40] sm:$0xff]  ;;  %v1371_v46 = vld [vmem:[#allocation6 + $0xb8] sm:$0xff] }
  0x20   :  { %v1336_v32 = vand.u32 4294901760, %v1321_v26  ;;  %971 = vmatpush3.msra.mxu0 %v1286_v9  ;;  %v1903_v33 = vand.u32 4294901760, %v1313_v23  ;;  %v1342_v35 = vsub.f32 %v72_v7, %v1288_v10  ;;  %v1345_v36 = vand.u32 4294901760, %v1323_v27  ;;  %v1381_v51 = vld [vmem:[#allocation6 + $0x38] sm:$0xff]  ;;  %v1388_v56 = vld [vmem:[#allocation6 + $0xb0] sm:$0xff]  ;;  %v1412_v2 = vld [vmem:[#allocation6 + $0xa8] sm:$0xff] }
  0x21   :  { %1962 = vst [vmem:[#allocation12_spill] sm:$0xff] %v1330_v30  ;;  %v1902_v34 = vand.u32 4294901760, %v1319_v25  ;;  %972 = vmatprep.subr.mxu0 %v1288_v10  ;;  %v316_v38 = vsub.f32 %v1300_v18, %v1905_v29  ;;  %v1900_v39 = vand.u32 4294901760, %v1333_v31  ;;  %v1355_v40 = vsub.f32 %v56_v8, %v1290_v11  ;;  %v1400_v61 = vld [vmem:[#allocation6 + $0x30] sm:$0xff] }
  0x22   :  { %1963 = vst [vmem:[#allocation13_spill] sm:$0xff] %v1336_v32  ;;  %1964 = vst [vmem:[#allocation14_spill] sm:$0xff] %v1345_v36  ;;  %v1358_v41 = vand.u32 4294901760, %v1325_v28  ;;  %973 = vmatpush3.msra.mxu0 %v1290_v11  ;;  %v204_v42 = vsub.f32 %v1313_v23, %v1903_v33  ;;  %v1898_v44 = vand.u32 4294901760, %v1342_v35  ;;  %v1369_v45 = vsub.f32 %v71_v12, %v1293_v15 }
  0x23   :  { %v323_v43 = vsub.f32 %v1319_v25, %v1902_v34  ;;  %974 = vmatprep.subr.mxu0 %v1293_v15  ;;  %v317_v47 = vand.u32 4294901760, %v316_v38  ;;  %v211_v48 = vsub.f32 %v1333_v31, %v1900_v39  ;;  %v1897_v49 = vand.u32 4294901760, %v1355_v40  ;;  %v1503_v39 = vld [vmem:[#allocation6 + $0x90] sm:$0xff] }
  0x24   :  { %1965 = vst [vmem:[#allocation15_spill] sm:$0xff] %v1358_v41  ;;  %v1379_v50 = vand.u32 4294901760, %v1347_v37  ;;  %975 = vmatpush3.msra.mxu0 %v1295_v16  ;;  %v205_v52 = vand.u32 4294901760, %v204_v42  ;;  %v330_v54 = vsub.f32 %v1342_v35, %v1898_v44  ;;  %v1895_v55 = vand.u32 4294901760, %v1369_v45  ;;  %v1513_v34 = vld [vmem:[#allocation6 + $0x10] sm:$0xff] }
  0x25   :  { %v324_v53 = vand.u32 4294901760, %v323_v43  ;;  %976 = vmatprep.subr.mxu0 %v1297_v17  ;;  %1003 = vmatprep.subr.mxu1 %v317_v47  ;;  %v212_v57 = vand.u32 4294901760, %v211_v48  ;;  %v218_v58 = vsub.f32 %v1355_v40, %v1897_v49  ;;  %v1395_v59 = vsub.f32 %v55_v13, %v1295_v16  ;;  %v1423_v13 = vld [vmem:[#allocation6 + $0x28] sm:$0xff]  ;;  %v1490_v49 = vld [vmem:[#allocation6 + $0x18] sm:$0xff] }
  0x26   :  { %1966 = vst [vmem:[#allocation16_spill] sm:$0xff] %v1379_v50  ;;  %v1398_v60 = vand.u32 4294901760, %v1371_v46  ;;  %977 = vmatpush3.msra.mxu0 %v1310_v22  ;;  %1004 = vmatpush3.msra.mxu1 %v205_v52  ;;  %v331_v62 = vand.u32 4294901760, %v330_v54  ;;  %v337_v63 = vsub.f32 %v1369_v45, %v1895_v55  ;;  %v1407_v0 = vsub.f32 %v70_v14, %v1297_v17 }
  0x27   :  { %v1410_v1 = vand.u32 4294901760, %v1381_v51  ;;  %978 = vmatprep.subr.mxu0 %v1316_v24  ;;  %1005 = vmatprep.subr.mxu1 %v324_v53  ;;  %v219_v6 = vand.u32 4294901760, %v218_v58  ;;  %v1893_v7 = vand.u32 4294901760, %v1395_v59  ;;  %v1418_v8 = vsub.f32 %v1302_v19, %v1310_v22 }
  0x28   :  { %1967 = vst [vmem:[#allocation17_spill] sm:$0xff] %v1398_v60  ;;  %v1421_v12 = vand.u32 4294901760, %v1388_v56  ;;  %979 = vmatpush3.msra.mxu0 %v1330_v30  ;;  %1006 = vmatpush3.msra.mxu1 %v212_v57  ;;  %v338_v14 = vand.u32 4294901760, %v337_v63  ;;  %v1892_v38 = vand.u32 4294901760, %v1407_v0  ;;  %v1429_v42 = vsub.f32 %v1304_v20, %v1316_v24  ;;  %v1446_v20 = vld [vmem:[#allocation6 + $0xa0] sm:$0xff] }
  0x29   :  { %1968 = vst [vmem:[#allocation18_spill] sm:$0xff] %v1410_v1  ;;  %v1432_v43 = vand.u32 4294901760, %v1400_v61  ;;  %980 = vmatprep.subr.mxu0 %v1336_v32  ;;  %1007 = vmatprep.subr.mxu1 %v331_v62  ;;  %v225_v19 = vsub.f32 %v1395_v59, %v1893_v7  ;;  %v1894_v47 = vand.u32 4294901760, %v1418_v8  ;;  %v1441_v48 = vsub.f32 %v1306_v21, %v1330_v30 }
  0x2a   :  { %1969 = vst [vmem:[#allocation19_spill] sm:$0xff] %v1421_v12  ;;  %v1444_v52 = vand.u32 4294901760, %v1412_v2  ;;  %981 = vmatpush3.msra.mxu0 %v1345_v36  ;;  %1008 = vmatpush3.msra.mxu1 %v219_v6  ;;  %v344_v53 = vsub.f32 %v1407_v0, %v1892_v38  ;;  %v1896_v54 = vand.u32 4294901760, %v1429_v42  ;;  %v1455_v57 = vsub.f32 %v1321_v26, %v1336_v32  ;;  %v1469_v38 = vld [vmem:[#allocation6 + $0x20] sm:$0xff] }
  0x2b   :  { %1970 = vst [vmem:[#allocation20_spill] sm:$0xff] %v1432_v43  ;;  %v1458_v21 = vand.u32 4294901760, %v1423_v13  ;;  %982 = vmatprep.subr.mxu0 %v1358_v41  ;;  %1009 = vmatprep.subr.mxu1 %v338_v14  ;;  %v226_v58 = vand.u32 4294901760, %v225_v19  ;;  %v232_v62 = vsub.f32 %v1418_v8, %v1894_v47  ;;  %v1899_v63 = vand.u32 4294901760, %v1441_v48  ;;  %v1479_v47 = vld [vmem:[#allocation6 + $0x98] sm:$0xff] }
  0x2c   :  { %1971 = vst [vmem:[#allocation21_spill] sm:$0xff] %v1444_v52  ;;  %v1467_v6 = vsub.f32 %v1323_v27, %v1345_v36  ;;  %983 = vmatpush3.msra.mxu0 %v1379_v50  ;;  %v345_v26 = vand.u32 4294901760, %v344_v53  ;;  %v351_v14 = vsub.f32 %v1429_v42, %v1896_v54  ;;  %v1901_v19 = vand.u32 4294901760, %v1455_v57 }
  0x2d   :  { %1972 = vst [vmem:[#allocation22_spill] sm:$0xff] %v1458_v21  ;;  %v1477_v7 = vand.u32 4294901760, %v1446_v20  ;;  %1010 = vmatpush3.msra.mxu1 %v226_v58  ;;  %984 = vmatprep.subr.mxu0 %v1398_v60  ;;  %v233_v27 = vand.u32 4294901760, %v232_v62  ;;  %v239_v55 = vsub.f32 %v1441_v48, %v1899_v63  ;;  %v1488_v54 = vsub.f32 %v1325_v28, %v1358_v41 }
  0x2e   :  { %v1904_v53 = vand.u32 4294901760, %v1467_v6  ;;  %1011 = vmatprep.subr.mxu1 %v345_v26  ;;  %985 = vmatpush3.msra.mxu0 %v1410_v1  ;;  %v352_v44 = vand.u32 4294901760, %v351_v14  ;;  %v358_v58 = vsub.f32 %v1455_v57, %v1901_v19  ;;  %v1497_v62 = vand.u32 4294901760, %v1469_v38 }
  0x2f   :  { %1973 = vst [vmem:[#allocation23_spill] sm:$0xff] %v1477_v7  ;;  %v1501_v63 = vsub.f32 %v1347_v37, %v1379_v50  ;;  %1012 = vmatpush3.msra.mxu1 %v233_v27  ;;  %986 = vmatprep.subr.mxu0 %v1421_v12  ;;  %v240_v28 = vand.u32 4294901760, %v239_v55  ;;  %v1908_v14 = vand.u32 4294901760, %v1488_v54  ;;  %v1511_v19 = vand.u32 4294901760, %v1479_v47 }
  0x30   :  { %1974 = vst [vmem:[#allocation24_spill] sm:$0xff] %v1497_v62  ;;  %v246_v26 = vsub.f32 %v1467_v6, %v1904_v53  ;;  %1013 = vmatprep.subr.mxu1 %v352_v44  ;;  %987 = vmatpush3.msra.mxu0 %v1432_v43  ;;  %v359_v37 = vand.u32 4294901760, %v358_v58  ;;  %v1519_v55 = vsub.f32 %v1371_v46, %v1398_v60  ;;  %v1522_v33 = vand.u32 4294901760, %v1490_v49  ;;  %v1524_v53 = vld [vmem:[#allocation6 + $0x88] sm:$0xff] }
  0x31   :  { %1975 = vst [vmem:[#allocation25_spill] sm:$0xff] %v1511_v19  ;;  %v1911_v27 = vand.u32 4294901760, %v1501_v63  ;;  %1014 = vmatpush3.msra.mxu1 %v240_v28  ;;  %988 = vmatprep.subr.mxu0 %v1444_v52  ;;  %v365_v44 = vsub.f32 %v1488_v54, %v1908_v14  ;;  %v1532_v58 = vsub.f32 %v1381_v51, %v1410_v1  ;;  %v1535_v46 = vand.u32 4294901760, %v1503_v39  ;;  %v1549_v51 = vld [vmem:[#allocation6 + $0x8] sm:$0xff] }
  0x32   :  { %1976 = vst [vmem:[#allocation26_spill] sm:$0xff] %v1522_v33  ;;  %v247_v29 = vand.u32 4294901760, %v246_v26  ;;  %1015 = vmatprep.subr.mxu1 %v359_v37  ;;  %989 = vmatpush3.msra.mxu0 %v1458_v21  ;;  %v1544_v60 = vsub.f32 %v1388_v56, %v1421_v12  ;;  %v1547_v14 = vand.u32 4294901760, %v1513_v34  ;;  %v1558_v26 = vand.u32 4294901760, %v1524_v53  ;;  %v1560_v56 = vld [vmem:[#allocation6 + $0x80] sm:$0xff] }
  0x33   :  { %1977 = vst [vmem:[#allocation27_spill] sm:$0xff] %v1535_v46  ;;  %v253_v28 = vsub.f32 %v1501_v63, %v1911_v27  ;;  %990 = vmatprep.subr.mxu0 %v1477_v7  ;;  %v366_v37 = vand.u32 4294901760, %v365_v44  ;;  %v1555_v27 = vsub.f32 %v1400_v61, %v1432_v43  ;;  %v1981_v50 = vand.u32 4294901760, %v1519_v55  ;;  %v1571_v61 = vld [vmem:[#allocation6] sm:$0xff] }
  0x34   :  { %1978 = vst [vmem:[#allocation28_spill] sm:$0xff] %v1547_v14  ;;  %1016 = vmatpush3.msra.mxu1 %v247_v29  ;;  %1980 = vst [vmem:[#allocation30_spill] sm:$0xff] %v1558_v26  ;;  %991 = vmatpush3.msra.mxu0 %v1497_v62  ;;  %v1569_v1 = vsub.f32 %v1412_v2, %v1444_v52  ;;  %v1983_v43 = vand.u32 4294901760, %v1532_v58  ;;  %v1579_v36 = vand.u32 4294901760, %v1549_v51  ;;  %v1607_v30 = vand.u32 4294901760, %v1571_v61 }
  0x35   :  { %1979 = vst [vmem:[#allocation29_spill] sm:$0xff] %v1555_v27  ;;  %v254_v12 = vand.u32 4294901760, %v253_v28  ;;  %v372_v29 = vsub.f32 %v1519_v55, %v1981_v50  ;;  %1017 = vmatprep.subr.mxu1 %v366_v37  ;;  %992 = vmatprep.subr.mxu0 %v1511_v19  ;;  %v1583_v50 = vsub.f32 %v1423_v13, %v1458_v21  ;;  %v967_v2 = vld.sshfl [vmem:[#allocation3] sm:$0x33 pattern:$0x76325410] }
  0x36   :  { %1982 = vst [vmem:[#allocation31_spill] sm:$0xff] %v1569_v1  ;;  %v260_v41 = vsub.f32 %v1532_v58, %v1983_v43  ;;  %1984 = vst [vmem:[#allocation32_spill] sm:$0xff] %v1579_v36  ;;  %993 = vmatpush3.msra.mxu0 %v1522_v33  ;;  %v1985_v37 = vand.u32 4294901760, %v1544_v60  ;;  %v1932_v43 = vand.u32 4294901760, %v1569_v1  ;;  %v1591_v28 = vand.u32 4294901760, %v1560_v56 }
  0x37   :  { %1018 = vmatpush3.msra.mxu1 %v254_v12  ;;  %v373_v44 = vand.u32 4294901760, %v372_v29  ;;  %994 = vmatprep.subr.mxu0 %v1535_v46  ;;  %v1986_v13 = vand.u32 4294901760, %v1555_v27  ;;  %v1600_v29 = vsub.f32 %v1446_v20, %v1477_v7  ;;  %v1987_v20 = vand.u32 4294901760, %v1583_v50 }
  0x38   :  { %v379_v52 = vsub.f32 %v1544_v60, %v1985_v37  ;;  %v261_v32 = vand.u32 4294901760, %v260_v41  ;;  %995 = vmatpush3.msra.mxu0 %v1547_v14  ;;  %v386_v41 = vsub.f32 %v1569_v1, %v1932_v43  ;;  %v85_v7 = vcombine.high %v967_v2, %v967_v2 }
  0x39   :  { %v267_v21 = vsub.f32 %v1555_v27, %v1986_v13  ;;  %1019 = vmatprep.subr.mxu1 %v373_v44  ;;  %v1611_v13 = vsub.f32 %v1469_v38, %v1497_v62  ;;  %996 = vmatprep.subr.mxu0 %v1558_v26  ;;  %v1937_v44 = vand.u32 4294901760, %v1600_v29  ;;  %v1620_v27 = vand.u32 4294901760, %v967_v2 }
  0x3a   :  { %v380_v37 = vand.u32 4294901760, %v379_v52  ;;  %1020 = vmatpush3.msra.mxu1 %v261_v32  ;;  %v274_v52 = vsub.f32 %v1583_v50, %v1987_v20  ;;  %v387_v43 = vand.u32 4294901760, %v386_v41  ;;  %997 = vmatpush3.msra.mxu0 %v1579_v36  ;;  %v1624_v32 = vsub.f32 %v1479_v47, %v1511_v19 }
  0x3b   :  { %v268_v12 = vand.u32 4294901760, %v267_v21  ;;  %v1938_v1 = vand.u32 4294901760, %v1611_v13  ;;  %1988 = vst [vmem:[#allocation33_spill] sm:$0xff] %v1620_v27  ;;  %998 = vmatprep.subr.mxu0 %v1591_v28  ;;  %v393_v21 = vsub.f32 %v1600_v29, %v1937_v44  ;;  %v1634_v41 = vsub.f32 %v1490_v49, %v1522_v33 }
  0x3c   :  { %1021 = vmatprep.subr.mxu1 %v380_v37  ;;  %v275_v38 = vand.u32 4294901760, %v274_v52  ;;  %v1630_v37 = vand.u32 4294901760, %v85_v7  ;;  %999 = vmatpush3.msra.mxu0 %v1607_v30  ;;  %v1642_v20 = vsub.f32 %v967_v2, %v1620_v27  ;;  %v1646_v52 = vsub.f32 %v1503_v39, %v1535_v46 }
  0x3d   :  { %1022 = vmatpush3.msra.mxu1 %v268_v12  ;;  %v281_v47 = vsub.f32 %v1611_v13, %v1938_v1  ;;  %v394_v44 = vand.u32 4294901760, %v393_v21  ;;  %1038 = vmatprep.subr.mxu0 %v1300_v18  ;;  %v1655_v1 = vsub.f32 %v1513_v34, %v1547_v14  ;;  %v1990_v2 = vand.u32 4294901760, %v1624_v32 }
  0x3e   :  { %1989 = vst [vmem:[#allocation34_spill] sm:$0xff] %v1630_v37  ;;  %1023 = vmatprep.subr.mxu1 %v387_v43  ;;  %v1649_v49 = vsub.f32 %v85_v7, %v1630_v37  ;;  %v1943_v43 = vand.u32 4294901760, %v1634_v41  ;;  %v1946_v39 = vand.u32 4294901760, %v1642_v20  ;;  %425 = vmatprep.mubr.f32.mxu1 %v1630_v37  ;;  %v1680_v37 = vsub.f32 %v1549_v51, %v1579_v36 }
  0x3f   :  { %1024 = vmatpush3.msra.mxu1 %v275_v38  ;;  %v282_v12 = vand.u32 4294901760, %v281_v47  ;;  %v400_v33 = vsub.f32 %v1624_v32, %v1990_v2  ;;  %v1670_v47 = vsub.f32 %v1524_v53, %v1558_v26  ;;  %v1692_v51 = vsub.f32 %v1560_v56, %v1591_v28 }
  0x40   :  { %1025 = vmatprep.subr.mxu1 %v394_v44  ;;  %v288_v21 = vsub.f32 %v1634_v41, %v1943_v43  ;;  %v193_v38 = vsub.f32 %v1642_v20, %v1946_v39  ;;  %v1991_v44 = vand.u32 4294901760, %v1646_v52  ;;  %v1992_v43 = vand.u32 4294901760, %v1649_v49 }
  0x41   :  { %1026 = vmatpush3.msra.mxu1 %v282_v12  ;;  %v401_v2 = vand.u32 4294901760, %v400_v33  ;;  %v1993_v12 = vand.u32 4294901760, %v1655_v1  ;;  %v1956_v26 = vand.u32 4294901760, %v1670_v47 }
  0x42   :  { %v407_v7 = vsub.f32 %v1646_v52, %v1991_v44  ;;  %v187_v34 = vsub.f32 %v1649_v49, %v1992_v43  ;;  %v289_v53 = vand.u32 4294901760, %v288_v21  ;;  %v194_v39 = vand.u32 4294901760, %v193_v38 }
  0x43   :  { %v295_v33 = vsub.f32 %v1655_v1, %v1993_v12  ;;  %1027 = vmatprep.subr.mxu1 %v401_v2  ;;  %v1955_v44 = vand.u32 4294901760, %v1680_v37  ;;  %v414_v43 = vsub.f32 %v1670_v47, %v1956_v26  ;;  %v1699_v21 = vsub.f32 %v1571_v61, %v1607_v30  ;;  %v1995_v61 = vld [vmem:[#allocation12_spill] sm:$0xff]  ;;  %v1997_v12 = vld [vmem:[#allocation13_spill] sm:$0xff]  ;;  %v2010_v26 = vld [vmem:[#allocation26_spill] sm:$0xff] }
  0x44   :  { %v408_v14 = vand.u32 4294901760, %v407_v7  ;;  %v188_v36 = vand.u32 4294901760, %v187_v34  ;;  %1028 = vmatpush3.msra.mxu1 %v289_v53  ;;  %v1954_v7 = vand.u32 4294901760, %v1692_v51 }
  0x45   :  { %v296_v46 = vand.u32 4294901760, %v295_v33  ;;  %1994 = vst [vmem:[#allocation35_spill] sm:$0xff] %v1699_v21  ;;  %v302_v38 = vsub.f32 %v1680_v37, %v1955_v44  ;;  %v415_v56 = vand.u32 4294901760, %v414_v43  ;;  %v1953_v34 = vand.u32 4294901760, %v1699_v21  ;;  %v1998_v33 = vld [vmem:[#allocation31_spill] sm:$0xff]  ;;  %v1999_v43 = vld [vmem:[#allocation14_spill] sm:$0xff] }
  0x46   :  { %1029 = vmatprep.subr.mxu1 %v408_v14  ;;  %189 = vmatprep.mubr.f32.mxu0 %v188_v36  ;;  %v421_v53 = vsub.f32 %v1692_v51, %v1954_v7  ;;  %v2008_v7 = vld [vmem:[#allocation23_spill] sm:$0xff]  ;;  %v2009_v44 = vand.u32 4294901760, %v1300_v18  ;;  %v2017_v18 = vand.u32 4294901760, %v1342_v35 }
  0x47   :  { %1030 = vmatpush3.msra.mxu1 %v296_v46  ;;  %195 = vmatmul.mubr.f32.vlgmr.msra.gmra.mxu0 %v194_v39  ;;  %v303_v2 = vand.u32 4294901760, %v302_v38  ;;  %v309_v14 = vsub.f32 %v1699_v21, %v1953_v34  ;;  %v1996_v39 = vld [vmem:[#allocation29_spill] sm:$0xff]  ;;  %v2000_v38 = vld [vmem:[#allocation15_spill] sm:$0xff]  ;;  %v2007_v34 = vld [vmem:[#allocation22_spill] sm:$0xff] }
  0x48   :  { %1039 = vmatpush3.msra.mxu0 %v1313_v23  ;;  %1031 = vmatprep.subr.mxu1 %v415_v56  ;;  %v422_v36 = vand.u32 4294901760, %v421_v53  ;;  %v2001_v56 = vld [vmem:[#allocation16_spill] sm:$0xff]  ;;  %v2003_v53 = vld [vmem:[#allocation18_spill] sm:$0xff] }
  0x49   :  { %1040 = vmatprep.subr.mxu0 %v1319_v25  ;;  %1032 = vmatpush3.msra.mxu1 %v303_v2  ;;  %v310_v46 = vand.u32 4294901760, %v309_v14  ;;  %v2002_v2 = vld [vmem:[#allocation17_spill] sm:$0xff]  ;;  %v2004_v14 = vld [vmem:[#allocation19_spill] sm:$0xff] }
  0x4a   :  { %1041 = vmatpush3.msra.mxu0 %v1333_v31  ;;  %562 = vmatprep.mubr.f32.mxu0 %v1649_v49 }
  0x4b   :  { %1042 = vmatprep.subr.mxu0 %v1342_v35  ;;  %1033 = vmatprep.subr.mxu1 %v422_v36  ;;  %v2005_v36 = vld [vmem:[#allocation20_spill] sm:$0xff]  ;;  %v2023_v35 = vand.u32 4294901760, %v1642_v20 }
  0x4c   :  { %1043 = vmatpush3.msra.mxu0 %v1355_v40  ;;  %1034 = vmatpush3.msra.mxu1 %v310_v46  ;;  %v2006_v46 = vld [vmem:[#allocation21_spill] sm:$0xff] }
  0x4d   :  { %1044 = vmatprep.subr.mxu0 %v1369_v45  ;;  %427 = vmatmul.mubr.f32.vlgmr.msra.gmra.mxu1 %v1620_v27  ;;  %v2011_v27 = vand.u32 4294901760, %v1313_v23  ;;  %v2019_v23 = vand.u32 4294901760, %v1355_v40  ;;  %v2025_v40 = vand.u32 4294901760, %v1418_v8 }
  0x4e   :  { %1045 = vmatpush3.msra.mxu0 %v1395_v59  ;;  %1073 = vmatprep.subr.mxu1 %v1280_v3 }
  0x4f   :  { %1046 = vmatprep.subr.mxu0 %v1407_v0  ;;  %1074 = vmatpush3.msra.mxu1 %v1282_v4 }
  0x50   :  { %1047 = vmatpush3.msra.mxu0 %v1418_v8  ;;  %1075 = vmatprep.subr.mxu1 %v1284_v5  ;;  %v2041_v8 = vand.u32 4294901760, %v1634_v41 }
  0x51   :  { %1048 = vmatprep.subr.mxu0 %v1429_v42  ;;  %1076 = vmatpush3.msra.mxu1 %v1286_v9 }
  0x52   :  { %1049 = vmatpush3.msra.mxu0 %v1441_v48  ;;  %1077 = vmatprep.subr.mxu1 %v1288_v10 }
  0x53   :  { %1050 = vmatprep.subr.mxu0 %v1455_v57  ;;  %1078 = vmatpush3.msra.mxu1 %v1290_v11 }
  0x54   :  { %1051 = vmatpush3.msra.mxu0 %v1467_v6  ;;  %1079 = vmatprep.subr.mxu1 %v1293_v15 }
  0x55   :  { %1052 = vmatprep.subr.mxu0 %v1488_v54  ;;  %1080 = vmatpush3.msra.mxu1 %v1295_v16 }
  0x56   :  { %1053 = vmatpush3.msra.mxu0 %v1501_v63  ;;  %1081 = vmatprep.subr.mxu1 %v1297_v17 }
  0x57   :  { %1054 = vmatprep.subr.mxu0 %v1519_v55  ;;  %1082 = vmatpush3.msra.mxu1 %v1310_v22 }
  0x58   :  { %1055 = vmatpush3.msra.mxu0 %v1532_v58  ;;  %1083 = vmatprep.subr.mxu1 %v1316_v24 }
  0x59   :  { %1056 = vmatprep.subr.mxu0 %v1544_v60  ;;  %1084 = vmatpush3.msra.mxu1 %v1995_v61 }
  0x5a   :  { %1057 = vmatpush3.msra.mxu0 %v1996_v39  ;;  %1085 = vmatprep.subr.mxu1 %v1997_v12 }
  0x5b   :  { %1058 = vmatprep.subr.mxu0 %v1998_v33  ;;  %1086 = vmatpush3.msra.mxu1 %v1999_v43 }
  0x5c   :  { %1059 = vmatpush3.msra.mxu0 %v1583_v50  ;;  %1087 = vmatprep.subr.mxu1 %v2000_v38 }
  0x5d   :  { %1060 = vmatprep.subr.mxu0 %v1600_v29  ;;  %1088 = vmatpush3.msra.mxu1 %v2001_v56 }
  0x5e   :  { %1061 = vmatpush3.msra.mxu0 %v1611_v13  ;;  %1089 = vmatprep.subr.mxu1 %v2002_v2 }
  0x5f   :  { %1062 = vmatprep.subr.mxu0 %v1624_v32  ;;  %1090 = vmatpush3.msra.mxu1 %v2003_v53 }
  0x60   :  { %1063 = vmatpush3.msra.mxu0 %v1634_v41  ;;  %1091 = vmatprep.subr.mxu1 %v2004_v14 }
  0x61   :  { %1064 = vmatprep.subr.mxu0 %v1646_v52  ;;  %1092 = vmatpush3.msra.mxu1 %v2005_v36 }
  0x62   :  { %1065 = vmatpush3.msra.mxu0 %v1655_v1  ;;  %1093 = vmatprep.subr.mxu1 %v2006_v46 }
  0x63   :  { %1066 = vmatprep.subr.mxu0 %v1670_v47  ;;  %1094 = vmatpush3.msra.mxu1 %v2007_v34  ;;  %v2012_v34 = vld [vmem:[#allocation27_spill] sm:$0xff] }
  0x64   :  { %1067 = vmatpush3.msra.mxu0 %v1680_v37  ;;  %1095 = vmatprep.subr.mxu1 %v2008_v7  ;;  %v2013_v7 = vand.u32 4294901760, %v1319_v25  ;;  %v2020_v25 = vand.u32 4294901760, %v1369_v45  ;;  %v2026_v45 = vand.u32 4294901760, %v1429_v42  ;;  %v2042_v42 = vand.u32 4294901760, %v1646_v52 }
  0x65   :  { %1068 = vmatprep.subr.mxu0 %v1692_v51  ;;  %1096 = vmatpush3.msra.mxu1 %v1497_v62  ;;  %v2014_v62 = vld [vmem:[#allocation28_spill] sm:$0xff] }
  0x66   :  { %1069 = vmatpush3.msra.mxu0 %v1699_v21  ;;  %1097 = vmatprep.subr.mxu1 %v1511_v19  ;;  %v2015_v21 = vand.u32 4294901760, %v1333_v31  ;;  %v2016_v19 = vld [vmem:[#allocation30_spill] sm:$0xff]  ;;  %v2021_v31 = vand.u32 4294901760, %v1649_v49 }
  0x67   :  { %565 = vmatmul.mubr.f32.vlgmr.msra.gmra.mxu0 %v1642_v20  ;;  %1108 = vmatprep.subr.mxu0 %v2009_v44  ;;  %v2018_v44 = vld [vmem:[#allocation32_spill] sm:$0xff] }
  0x68   :  { %1098 = vmatpush3.msra.mxu1 %v2010_v26  ;;  %1109 = vmatpush3.msra.mxu0 %v2011_v27  ;;  %v2022_v27 = vand.u32 4294901760, %v1395_v59  ;;  %v2027_v59 = vand.u32 4294901760, %v1441_v48  ;;  %v2043_v48 = vand.u32 4294901760, %v1655_v1 }
  0x69   :  { %1099 = vmatprep.subr.mxu1 %v2012_v34  ;;  %1110 = vmatprep.subr.mxu0 %v2013_v7 }
  0x6a   :  { %1100 = vmatpush3.msra.mxu1 %v2014_v62  ;;  %1111 = vmatpush3.msra.mxu0 %v2015_v21  ;;  %v2024_v21 = vand.u32 4294901760, %v1407_v0  ;;  %v2028_v0 = vand.u32 4294901760, %v1455_v57  ;;  %v2045_v57 = vand.u32 4294901760, %v1680_v37 }
  0x6b   :  { %1101 = vmatprep.subr.mxu1 %v2016_v19  ;;  %1112 = vmatprep.subr.mxu0 %v2017_v18 }
  0x6c   :  { %1102 = vmatpush3.msra.mxu1 %v2018_v44  ;;  %1113 = vmatpush3.msra.mxu0 %v2019_v23 }
  0x6d   :  { %1103 = vmatprep.subr.mxu1 %v1591_v28  ;;  %1114 = vmatprep.subr.mxu0 %v2020_v25 }
  0x6e   :  { %1104 = vmatpush3.msra.mxu1 %v1607_v30  ;;  %669 = vmatprep.mubr.f32.mxu1 %v2021_v31 }
  0x6f   :  { %1115 = vmatpush3.msra.mxu0 %v2022_v27  ;;  %673 = vmatmul.mubr.f32.vlgmr.msra.gmra.mxu1 %v2023_v35 }
  0x70   :  { %1116 = vmatprep.subr.mxu0 %v2024_v21  ;;  %1143 = vmatprep.subr.mxu1 %v1280_v3  ;;  %v2029_v3 = vand.u32 4294901760, %v1467_v6  ;;  %v2047_v6 = vand.u32 4294901760, %v1692_v51 }
  0x71   :  { %1117 = vmatpush3.msra.mxu0 %v2025_v40  ;;  %1144 = vmatpush3.msra.mxu1 %v1282_v4  ;;  %v2030_v4 = vand.u32 4294901760, %v1488_v54  ;;  %v2044_v54 = vand.u32 4294901760, %v1670_v47 }
  0x72   :  { %1118 = vmatprep.subr.mxu0 %v2026_v45  ;;  %1145 = vmatprep.subr.mxu1 %v1284_v5  ;;  %v2031_v5 = vand.u32 4294901760, %v1501_v63  ;;  %v2046_v63 = vld [vmem:[#allocation22_spill] sm:$0xff] }
  0x73   :  { %1119 = vmatpush3.msra.mxu0 %v2027_v59  ;;  %1146 = vmatpush3.msra.mxu1 %v1286_v9  ;;  %v2032_v9 = vand.u32 4294901760, %v1519_v55  ;;  %v2048_v55 = vld [vmem:[#allocation23_spill] sm:$0xff] }
  0x74   :  { %1120 = vmatprep.subr.mxu0 %v2028_v0  ;;  %1147 = vmatprep.subr.mxu1 %v1288_v10  ;;  %v2033_v10 = vand.u32 4294901760, %v1532_v58  ;;  %v2049_v58 = vld [vmem:[#allocation35_spill] sm:$0xff] }
  0x75   :  { %1121 = vmatpush3.msra.mxu0 %v2029_v3  ;;  %1148 = vmatpush3.msra.mxu1 %v1290_v11  ;;  %v2034_v11 = vand.u32 4294901760, %v1544_v60  ;;  %v2040_v60 = vand.u32 4294901760, %v1624_v32  ;;  %v2050_v1 = vand.u32 4294901760, %v2049_v58  ;;  %v2054_v32 = vld [vmem:[#allocation25_spill] sm:$0xff] }
  0x76   :  { %1122 = vmatprep.subr.mxu0 %v2030_v4  ;;  %1149 = vmatprep.subr.mxu1 %v1293_v15  ;;  %v2035_v15 = vand.u32 4294901760, %v1996_v39 }
  0x77   :  { %1123 = vmatpush3.msra.mxu0 %v2031_v5  ;;  %1150 = vmatpush3.msra.mxu1 %v1295_v16  ;;  %v2036_v16 = vand.u32 4294901760, %v1998_v33 }
  0x78   :  { %1124 = vmatprep.subr.mxu0 %v2032_v9  ;;  %1151 = vmatprep.subr.mxu1 %v1297_v17  ;;  %v2037_v17 = vand.u32 4294901760, %v1583_v50  ;;  %v2051_v50 = vld [vmem:[#allocation34_spill] sm:$0xff] }
  0x79   :  { %1125 = vmatpush3.msra.mxu0 %v2033_v10  ;;  %1152 = vmatpush3.msra.mxu1 %v1310_v22  ;;  %v2038_v22 = vand.u32 4294901760, %v1600_v29  ;;  %v2052_v29 = vld [vmem:[#allocation24_spill] sm:$0xff] }
  0x7a   :  { %1126 = vmatprep.subr.mxu0 %v2034_v11  ;;  %1153 = vmatprep.subr.mxu1 %v1316_v24  ;;  %v2039_v24 = vand.u32 4294901760, %v1611_v13  ;;  %v2053_v13 = vld [vmem:[#allocation33_spill] sm:$0xff] }
  0x7b   :  { %1127 = vmatpush3.msra.mxu0 %v2035_v15  ;;  %1154 = vmatpush3.msra.mxu1 %v1995_v61 }
  0x7c   :  { %1128 = vmatprep.subr.mxu0 %v2036_v16  ;;  %1155 = vmatprep.subr.mxu1 %v1997_v12 }
  0x7d   :  { %1129 = vmatpush3.msra.mxu0 %v2037_v17  ;;  %1156 = vmatpush3.msra.mxu1 %v1999_v43 }
  0x7e   :  { %1130 = vmatprep.subr.mxu0 %v2038_v22  ;;  %1157 = vmatprep.subr.mxu1 %v2000_v38 }
  0x7f   :  { %1131 = vmatpush3.msra.mxu0 %v2039_v24  ;;  %1158 = vmatpush3.msra.mxu1 %v2001_v56 }
  0x80   :  { %1132 = vmatprep.subr.mxu0 %v2040_v60  ;;  %1159 = vmatprep.subr.mxu1 %v2002_v2 }
  0x81   :  { %1133 = vmatpush3.msra.mxu0 %v2041_v8  ;;  %1160 = vmatpush3.msra.mxu1 %v2003_v53 }
  0x82   :  { %1134 = vmatprep.subr.mxu0 %v2042_v42  ;;  %1161 = vmatprep.subr.mxu1 %v2004_v14 }
  0x83   :  { %1135 = vmatpush3.msra.mxu0 %v2043_v48  ;;  %1162 = vmatpush3.msra.mxu1 %v2005_v36 }
  0x84   :  { %1136 = vmatprep.subr.mxu0 %v2044_v54  ;;  %1163 = vmatprep.subr.mxu1 %v2006_v46 }
  0x85   :  { %1137 = vmatpush3.msra.mxu0 %v2045_v57  ;;  %1164 = vmatpush3.msra.mxu1 %v2046_v63 }
  0x86   :  { %1138 = vmatprep.subr.mxu0 %v2047_v6  ;;  %1165 = vmatprep.subr.mxu1 %v2048_v55 }
  0x87   :  { %1139 = vmatpush3.msra.mxu0 %v2050_v1  ;;  %839 = vmatprep.mubr.f32.mxu0 %v2051_v50 }
  0x88   :  { %1166 = vmatpush3.msra.mxu1 %v2052_v29  ;;  %841 = vmatmul.mubr.f32.vlgmr.msra.gmra.mxu0 %v2053_v13 }
  0x89   :  { %1167 = vmatprep.subr.mxu1 %v2054_v32  ;;  %943 = vmatprep.mubr.f32.mxu1 %v2051_v50 }
  0x8a   :  { %1168 = vmatpush3.msra.mxu1 %v2010_v26 }
  0x8b   :  { %1169 = vmatprep.subr.mxu1 %v2012_v34 }
  0x8c   :  { %1170 = vmatpush3.msra.mxu1 %v2014_v62  ;;  %v76_v62 = vstv %s1888_s0  ;;  %s1223_s0 = scalar_lea.vmem %s958_s25, 32 }
  0x8d   :  { %1171 = vmatprep.subr.mxu1 %v2016_v19  ;;  %p1224_p10 = scmp.ne.s32.totalorder %s958_s25, %s1223_s0  ;;  %p1229_p12 = scmp.lt.s32.totalorder %s1223_s0, %s1223_s0 }
  0x8e   :  { %1172 = vmatpush3.msra.mxu1 %v2018_v44 }
  0x8f   :  { %1173 = vmatprep.subr.mxu1 %v1591_v28  ;;  %p1230_p13 = por %p1229_p12, %p1228_p11 }
  0x90   :  { %1174 = vmatpush3.msra.mxu1 %v1607_v30 }
  0x91   :  { %945 = vmatmul.mubr.f32.vlgmr.msra.gmra.mxu1 %v2053_v13  ;;  %p1231_p0 = pnand %p1230_p13, %p1224_p10 }
 0x107   :  { %v1000_v37 = vpop.f32.mrf.mxu0 }
 0x109   :  { %v1001_v41 = vpop.f32.mrf.mxu0 }
 0x10a   :  { %v1002_v26 = vadd.f32 %v1001_v41, %v1000_v37 }
 0x10c   :  { %v197_v7 = vadd.f32 %v1002_v26, %v76_v62 }
 0x10d   :  { %v1035_v20 = vpop.f32.mrf.mxu1 }
 0x10f   :  { %v1036_v49 = vpop.f32.mrf.mxu1 }
 0x110   :  { %v1037_v34 = vadd.f32 %v1036_v49, %v1035_v20 }
 0x112   :  { %v429_v39 = vadd.f32 %v1037_v34, %v197_v7 }
 0x127   :  { %v1070_v52 = vpop.f32.mrf.mxu0 }
 0x129   :  { %v1071_v47 = vpop.f32.mrf.mxu0 }
 0x12a   :  { %v1072_v61 = vadd.f32 %v1071_v47, %v1070_v52 }
 0x12c   :  { %v567_v33 = vadd.f32 %v1072_v61, %v429_v39 }
 0x12f   :  { %v1105_v19 = vpop.f32.mrf.mxu1 }
 0x131   :  { %v1106_v28 = vpop.f32.mrf.mxu1 }
 0x132   :  { %v1107_v12 = vadd.f32 %v1106_v28, %v1105_v19 }
 0x134   :  { %v675_v56 = vadd.f32 %v1107_v12, %v567_v33 }
 0x148   :  { %v1140_v51 = vpop.f32.mrf.mxu0 }
 0x14a   :  { %v1141_v30 = vpop.f32.mrf.mxu0 }
 0x14b   :  { %v1142_v43 = vadd.f32 %v1141_v30, %v1140_v51 }
 0x14d   :  { %v843_v53 = vadd.f32 %v1142_v43, %v675_v56 }
 0x151   :  { %v1175_v38 = vpop.f32.mrf.mxu1 }
 0x153   :  { %v1176_v2 = vpop.f32.mrf.mxu1 }
 0x154   :  { %v1177_v14 = vadd.f32 %v1176_v2, %v1175_v38 }
 0x156   :  { %v947_v36 = vadd.f32 %v1177_v14, %v843_v53 }
 0x158   :  { %950 = vst [vmem:[#allocation8] sm:$0x3] %v947_v36 }
 0x159   :  { %1234 = shalt.err (!%p1231_p0)
}
 0x15a   :  { %960 = dma.vmem_to_hbm [thread:$0]  %s958_s25, 32, %s1891_s3, [#allocation5]  }
 0x15b   :  { %1247 = dma.done.wait [#allocation5], 32  }
 0x15c   :  { %1248 = vsyncadd [#allocation5], 4294967264 }
 0x15d   :  { %964 = vsyncpa [#allocation4], 1 }
 0x15e   :  { %965 = vsyncpa [#allocation7], 1 }
 0x15f   :  { %966 = vsyncpa [#allocation5], 1 }

// kernel: tpu_custom_call.1
= control target key start
LH: loop header
LB: loop body
LE: loop exit
PB: predicated region body
PF: predicated region fallthrough
CT: control target
= control target key end

     0   :  { %9 = vsyncpa [#allocation4], 0  ;;  %s319_s0 = inlined_call_operand.<no memory space> [shape: f32[1], index: 0, kind: input, shape index: {}]   ;;  %s320_s1 = inlined_call_operand.hbm [shape: f32[2,256], index: 1, kind: input, shape index: {}]   ;;  %s321_s2 = inlined_call_operand.hbm [shape: f32[256,128], index: 2, kind: input, shape index: {}]   ;;  %s322_s3 = inlined_call_operand.hbm [shape: f32[2,128], index: 3, kind: output, shape index: {}]  }
   0x1   :  { %10 = vsyncpa [#allocation7], 0 }
   0x2   :  { %11 = vsyncpa [#allocation5], 0  ;;  %s282_s12 = smov [#allocation3]   ;;  %s283_s14 = smov [#allocation6]  }
   0x3   :  { %s20_s13 = sshll.u32 %s282_s12, 4  ;;  %s29_s15 = sshll.u32 %s283_s14, 4  ;;  %s21_s13 = int_to_ptr.vmem [resolvable:$true] %s20_s13  ;;  %s30_s15 = int_to_ptr.vmem [resolvable:$true] %s29_s15 }
   0x4   :  { %s224_s16 = scalar_lea.vmem %s21_s13, 64  ;;  %p229_p1 = scmp.lt.s32.totalorder %s21_s13, %s21_s13 }
   0x5   :  { %p225_p0 = scmp.ne.s32.totalorder %s21_s13, %s224_s16  ;;  %p230_p2 = scmp.lt.s32.totalorder %s224_s16, %s224_s16 }
   0x7   :  { %p231_p3 = por %p230_p2, %p229_p1 }
   0x9   :  { %p232_p4 = pnand %p231_p3, %p225_p0 }
   0xb   :  { %235 = shalt.err (!%p232_p4)
}
   0xc   :  { %23 = dma.hbm_to_vmem [thread:$0]  %s320_s1, 64, %s21_s13, [#allocation4]  }
   0xd   :  { %s244_s19 = scalar_lea.vmem %s30_s15, 4096  ;;  %p249_p6 = scmp.lt.s32.totalorder %s30_s15, %s30_s15 }
   0xe   :  { %p245_p5 = scmp.ne.s32.totalorder %s30_s15, %s244_s19  ;;  %p250_p7 = scmp.lt.s32.totalorder %s244_s19, %s244_s19 }
  0x10   :  { %p251_p8 = por %p250_p7, %p249_p6 }
  0x12   :  { %p252_p9 = pnand %p251_p8, %p245_p5 }
  0x14   :  { %255 = shalt.err (!%p252_p9)
}
  0x15   :  { %s284_s20 = smov 128   ;;  %s285_s21 = smov 8  }
  0x16   :  { %35 = dma.hbm_to_vmem [thread:$0]  %s321_s2, 4096, %s30_s15, [#allocation7], %s284_s20, %s284_s20, %s285_s21  }
  0x17   :  { %276 = dma.done.wait [#allocation4], 64  }
  0x18   :  { %277 = vsyncadd [#allocation4], 4294967232 }
  0x19   :  { %278 = dma.done.wait [#allocation7], 4096  }
  0x1a   :  { %279 = vsyncadd [#allocation7], 4294963200  ;;  %v74_v0 = vld [vmem:[#allocation6 + $0xf8] sm:$0xff]  ;;  %v73_v2 = vld [vmem:[#allocation6 + $0xf0] sm:$0xff]  ;;  %v76_v35 = vstv %s319_s0  ;;  %s286_s24 = smov [#allocation8]  }
  0x1b   :  { %v58_v1 = vld [vmem:[#allocation6 + $0x78] sm:$0xff]  ;;  %176 = vmatprep.subr.mxu0 %v74_v0  ;;  %v57_v3 = vld [vmem:[#allocation6 + $0x70] sm:$0xff]  ;;  %v72_v4 = vld [vmem:[#allocation6 + $0xe8] sm:$0xff]  ;;  %s165_s25 = sshll.u32 %s286_s24, 4  ;;  %s166_s25 = int_to_ptr.vmem [resolvable:$true] %s165_s25 }
  0x1c   :  { %177 = vmatpush3.msra.mxu0 %v58_v1  ;;  %v56_v5 = vld [vmem:[#allocation6 + $0x68] sm:$0xff]  ;;  %v71_v6 = vld [vmem:[#allocation6 + $0xe0] sm:$0xff]  ;;  %v70_v8 = vld [vmem:[#allocation6 + $0xd8] sm:$0xff]  ;;  %s256_s26 = scalar_lea.vmem %s166_s25, 32  ;;  %p261_p11 = scmp.lt.s32.totalorder %s166_s25, %s166_s25 }
  0x1d   :  { %178 = vmatprep.subr.mxu0 %v73_v2  ;;  %v55_v7 = vld [vmem:[#allocation6 + $0x60] sm:$0xff]  ;;  %v54_v9 = vld [vmem:[#allocation6 + $0x58] sm:$0xff]  ;;  %v69_v10 = vld [vmem:[#allocation6 + $0xd0] sm:$0xff]  ;;  %p257_p10 = scmp.ne.s32.totalorder %s166_s25, %s256_s26  ;;  %p262_p12 = scmp.lt.s32.totalorder %s256_s26, %s256_s26 }
  0x1e   :  { %179 = vmatpush3.msra.mxu0 %v57_v3  ;;  %v53_v11 = vld [vmem:[#allocation6 + $0x50] sm:$0xff]  ;;  %v68_v12 = vld [vmem:[#allocation6 + $0xc8] sm:$0xff]  ;;  %v175_v13 = vld.sshfl [vmem:[#allocation3] sm:$0x33 pattern:$0x76325410] }
  0x1f   :  { %180 = vmatprep.subr.mxu0 %v72_v4  ;;  %v52_v14 = vld [vmem:[#allocation6 + $0x48] sm:$0xff]  ;;  %v85_v15 = vcombine.high %v175_v13, %v175_v13  ;;  %v67_v16 = vld [vmem:[#allocation6 + $0xc0] sm:$0xff]  ;;  %v66_v18 = vld [vmem:[#allocation6 + $0xb8] sm:$0xff]  ;;  %p263_p13 = por %p262_p12, %p261_p11 }
  0x20   :  { %181 = vmatpush3.msra.mxu0 %v56_v5  ;;  %v51_v17 = vld [vmem:[#allocation6 + $0x40] sm:$0xff]  ;;  %v50_v19 = vld [vmem:[#allocation6 + $0x38] sm:$0xff]  ;;  %v65_v20 = vld [vmem:[#allocation6 + $0xb0] sm:$0xff] }
  0x21   :  { %182 = vmatprep.subr.mxu0 %v71_v6  ;;  %152 = vmatprep.mubr.f32.mxu0 %v85_v15  ;;  %v49_v21 = vld [vmem:[#allocation6 + $0x30] sm:$0xff]  ;;  %v64_v22 = vld [vmem:[#allocation6 + $0xa8] sm:$0xff]  ;;  %v63_v24 = vld [vmem:[#allocation6 + $0xa0] sm:$0xff]  ;;  %p264_p0 = pnand %p263_p13, %p257_p10 }
  0x22   :  { %183 = vmatpush3.msra.mxu0 %v55_v7  ;;  %v48_v23 = vld [vmem:[#allocation6 + $0x28] sm:$0xff]  ;;  %v47_v25 = vld [vmem:[#allocation6 + $0x20] sm:$0xff]  ;;  %v62_v26 = vld [vmem:[#allocation6 + $0x98] sm:$0xff] }
  0x23   :  { %184 = vmatprep.subr.mxu0 %v70_v8  ;;  %v46_v27 = vld [vmem:[#allocation6 + $0x18] sm:$0xff]  ;;  %v61_v28 = vld [vmem:[#allocation6 + $0x90] sm:$0xff]  ;;  %v60_v30 = vld [vmem:[#allocation6 + $0x88] sm:$0xff] }
  0x24   :  { %185 = vmatpush3.msra.mxu0 %v54_v9  ;;  %v45_v29 = vld [vmem:[#allocation6 + $0x10] sm:$0xff]  ;;  %v44_v31 = vld [vmem:[#allocation6 + $0x8] sm:$0xff]  ;;  %v59_v32 = vld [vmem:[#allocation6 + $0x80] sm:$0xff] }
  0x25   :  { %186 = vmatprep.subr.mxu0 %v69_v10  ;;  %v43_v33 = vld [vmem:[#allocation6] sm:$0xff] }
  0x26   :  { %187 = vmatpush3.msra.mxu0 %v53_v11 }
  0x27   :  { %188 = vmatprep.subr.mxu0 %v68_v12 }
  0x28   :  { %189 = vmatpush3.msra.mxu0 %v52_v14 }
  0x29   :  { %190 = vmatprep.subr.mxu0 %v67_v16 }
  0x2a   :  { %191 = vmatpush3.msra.mxu0 %v51_v17 }
  0x2b   :  { %192 = vmatprep.subr.mxu0 %v66_v18 }
  0x2c   :  { %193 = vmatpush3.msra.mxu0 %v50_v19 }
  0x2d   :  { %194 = vmatprep.subr.mxu0 %v65_v20 }
  0x2e   :  { %195 = vmatpush3.msra.mxu0 %v49_v21 }
  0x2f   :  { %196 = vmatprep.subr.mxu0 %v64_v22 }
  0x30   :  { %197 = vmatpush3.msra.mxu0 %v48_v23 }
  0x31   :  { %198 = vmatprep.subr.mxu0 %v63_v24 }
  0x32   :  { %199 = vmatpush3.msra.mxu0 %v47_v25 }
  0x33   :  { %200 = vmatprep.subr.mxu0 %v62_v26 }
  0x34   :  { %201 = vmatpush3.msra.mxu0 %v46_v27 }
  0x35   :  { %202 = vmatprep.subr.mxu0 %v61_v28 }
  0x36   :  { %203 = vmatpush3.msra.mxu0 %v45_v29 }
  0x37   :  { %204 = vmatprep.subr.mxu0 %v60_v30 }
  0x38   :  { %205 = vmatpush3.msra.mxu0 %v44_v31 }
  0x39   :  { %206 = vmatprep.subr.mxu0 %v59_v32 }
  0x3a   :  { %207 = vmatpush3.msra.mxu0 %v43_v33 }
  0x3b   :  { %153 = vmatmul.mubr.f32.vlgmr.msra.gmra.mxu0 %v175_v13 }
  0xfb   :  { %v208_v34 = vpop.f32.mrf.mxu0 }
  0xfd   :  { %v209_v36 = vpop.f32.mrf.mxu0 }
  0xfe   :  { %v210_v37 = vadd.f32 %v209_v36, %v208_v34 }
 0x100   :  { %v155_v38 = vadd.f32 %v210_v37, %v76_v35 }
 0x102   :  { %158 = vst [vmem:[#allocation8] sm:$0x3] %v155_v38 }
 0x103   :  { %267 = shalt.err (!%p264_p0)
}
 0x104   :  { %168 = dma.vmem_to_hbm [thread:$0]  %s166_s25, 32, %s322_s3, [#allocation5]  }
 0x105   :  { %280 = dma.done.wait [#allocation5], 32  }
 0x106   :  { %281 = vsyncadd [#allocation5], 4294967264 }
 0x107   :  { %172 = vsyncpa [#allocation4], 1 }
 0x108   :  { %173 = vsyncpa [#allocation7], 1 }
 0x109   :  { %174 = vsyncpa [#allocation5], 1 }

</bundles_post_ra>
